<compile_context>
chip_gen: v7x
topology: tpu7x:2x2x1
jax: 0.10.0
libtpu: 0.0.40
codegen_flags: <defaults>
</compile_context>

<pallas_src>
import jax
import jax.numpy as jnp
from jax import lax
from jax.experimental import pallas as pl
from jax.experimental.pallas import tpu as pltpu

FEATS = 128      # fixed by the module (feats = 128)
M = 100          # number of Linear(feats, 1) layers (m = 100)
M_PAD = 128      # lane-dense padded layer count
ALPHA = 0.1

TILE_B_MAX = 4096   # multiple of 256; double-buffered bf16 x tiles + f32 temps
                    # stay well under every generation's default scoped VMEM
TILE_B_MIN = 256    # multiple of 256: fills MXU rows, covers bf16 sublane packing


def _round_up(n, mult):
    return ((n + mult - 1) // mult) * mult


def _choose_tile_b(b):
    """Pick a batch tile: as large as possible (amortize per-grid-step overhead)
    but never one giant tile when the batch could feed both v7x TensorCores,
    and clamped to the VMEM-safe TILE_B_MAX."""
    half = -(-b // 2)                      # cdiv(b, 2): aim for >= 2 grid steps
    tile = _round_up(half, TILE_B_MIN)
    return max(TILE_B_MIN, min(TILE_B_MAX, tile))


def _net_kernel(x_ref, w_ref, o_ref):
    # x_ref: (tile_b, FEATS) compute-dtype batch tile streamed from HBM
    # w_ref: (FEATS, M_PAD)  compute-dtype stacked+zero-padded weights, resident
    # o_ref: (tile_b, 1)     f32
    z = jnp.dot(x_ref[...], w_ref[...],
                preferred_element_type=jnp.float32)      # (tile_b, M_PAD) f32 acc
    y = z * (z * z + ALPHA)                               # z**3 + alpha*z on VPU (f32)
    o_ref[...] = jnp.sum(y, axis=-1, keepdims=True)       # padded cols are exactly 0
    # TODO(synk): lane-dense (tile_b//128, 128) output block would avoid masked
    # vst.msk stores, but the required in-kernel (tile_b,1)->(tile_b//128,128)
    # sublane->lane relayout has shaky Mosaic reshape support; skipped for safety.


def net_forward(x, w_stacked, *, compute_dtype=jnp.bfloat16):
    """x: (B, ...) with prod(...) == feats; w_stacked: (feats, m). Returns (B, 1) f32.

    compute_dtype is used for the x/W DMA and the MXU matmul; accumulation and
    the nonlinearity are always f32.  bf16 halves HBM traffic (the kernel is
    bandwidth-bound); pass jnp.float32 for exact f32 parity.
    """
    b = x.shape[0]
    x2d = jnp.reshape(x, (b, -1))                          # torch.reshape(x, (B, -1))
    assert x2d.shape[1] == FEATS, f"expected flattened dim {FEATS}, got {x2d.shape[1]}"
    x2d = x2d.astype(compute_dtype)

    # Zero-pad weights (feats, m) -> (feats, 128): padded columns add 0 to the sum.
    m = w_stacked.shape[1]
    w = w_stacked.astype(compute_dtype)
    if m < M_PAD:
        w = jnp.pad(w, ((0, 0), (0, M_PAD - m)))

    # Batch tiling; padded rows are zeros -> z = 0 -> y = 0, and are sliced off.
    tile_b = _choose_tile_b(b)
    b_pad = _round_up(b, tile_b)
    if b_pad != b:
        x2d = jnp.pad(x2d, ((0, b_pad - b), (0, 0)))

    itemsize = jnp.dtype(compute_dtype).itemsize
    cost = pl.CostEstimate(
        flops=2 * b_pad * FEATS * M_PAD + 4 * b_pad * M_PAD,
        transcendentals=0,
        bytes_accessed=b_pad * FEATS * itemsize + FEATS * M_PAD * itemsize + b_pad * 4,
    )

    out = pl.pallas_call(
        _net_kernel,
        out_shape=jax.ShapeDtypeStruct((b_pad, 1), jnp.float32),
        grid_spec=pl.GridSpec(
            grid=(b_pad // tile_b,),
            in_specs=[
                pl.BlockSpec((tile_b, FEATS), lambda i: (i, 0)),   # streamed x tiles
                pl.BlockSpec((FEATS, M_PAD), lambda i: (0, 0)),    # W resident (fetched once)
            ],
            out_specs=pl.BlockSpec((tile_b, 1), lambda i: (i, 0)),
        ),
        compiler_params=pltpu.CompilerParams(
            dimension_semantics=("parallel",),   # shard batch tiles across TCs (v7x)
        ),
        cost_estimate=cost,
    )(x2d, w)

    return out[:b]


def reference_forward(x, w_stacked, *, compute_dtype=jnp.bfloat16):
    """Plain-JAX reference mirroring the PyTorch per-layer loop, with inputs
    rounded to the same compute dtype the kernel DMAs/matmuls in (math in f32,
    so it matches the kernel's f32-accumulating bf16 MXU path)."""
    b = x.shape[0]
    x2d = jnp.reshape(x, (b, -1)).astype(compute_dtype).astype(jnp.float32)
    w = w_stacked.astype(compute_dtype).astype(jnp.float32)
    agg = None
    for i in range(w.shape[1]):
        wi = w[:, i:i + 1]                                         # (feats, 1) layer weight
        y = jnp.dot(x2d, wi, precision=lax.Precision.HIGHEST)      # (B, 1)
        y = jnp.power(y, 3) + ALPHA * y
        agg = y if agg is None else agg + y
    return agg


if __name__ == "__main__":
    key = jax.random.PRNGKey(0)
    kx, kw = jax.random.split(key)

    # Small input whose flattened size matches feats=128: (B=8, C=2, H=8, W=8)
    B, C, H, W = 8, 2, 8, 8
    x = jax.random.normal(kx, (B, C, H, W), dtype=jnp.float32)

    # Deterministic weights mimicking nn.Linear default init U(-1/sqrt(feats), +),
    # stacked as (feats, m) so the kernel computes x @ W^T for all m layers at once.
    bound = 1.0 / jnp.sqrt(jnp.float32(FEATS))
    w_stacked = jax.random.uniform(kw, (FEATS, M), dtype=jnp.float32,
                                   minval=-bound, maxval=bound)

    out = net_forward(x, w_stacked)
    out = jax.block_until_ready(out)

    ref = reference_forward(x, w_stacked)
    assert out.shape == (B, 1), out.shape
    assert jnp.allclose(out, ref, atol=1e-3, rtol=1e-3), (out, ref)

    print("KERNEL_OK")
</pallas_src>

<mosaic_0001>
module attributes {stable_mosaic.version = 11 : i64} {
  func.func @_net_kernel(%arg0: i32, %arg1: memref<256x128xbf16, #tpu.memory_space<vmem>>, %arg2: memref<128x128xbf16, #tpu.memory_space<vmem>>, %arg3: memref<256x1xf32, #tpu.memory_space<vmem>>) attributes {dimension_semantics = [#tpu.dimension_semantics<parallel>], iteration_bounds = array<i64: 1>, scalar_prefetch = 0 : i64, scratch_operands = 0 : i64, tpu.core_type = #tpu.core_type<tc>, window_params = [{transform_indices = @transform_0, window_bounds = array<i64: 256, 128>}, {pipeline_mode = #tpu.pipeline_mode<synchronous>, transform_indices = @transform_1, window_bounds = array<i64: 128, 128>}, {transform_indices = @transform_2, window_bounds = array<i64: 256, 1>}]} {
    %c0 = arith.constant 0 : index
    %c0_0 = arith.constant 0 : index
    %0 = vector.load %arg1[%c0, %c0_0] : memref<256x128xbf16, #tpu.memory_space<vmem>>, vector<256x128xbf16>
    %c0_1 = arith.constant 0 : index
    %c0_2 = arith.constant 0 : index
    %1 = vector.load %arg2[%c0_1, %c0_2] : memref<128x128xbf16, #tpu.memory_space<vmem>>, vector<128x128xbf16>
    %cst = arith.constant dense<0.000000e+00> : vector<256x128xf32>
    %2 = tpu.matmul %0, %1, %cst {dimension_numbers = #tpu.dot_dimension_numbers<[1], [0], [0], [1], [0, 0, 1, 1], [], []>} : vector<256x128xbf16>, vector<128x128xbf16>, vector<256x128xf32> -> vector<256x128xf32>
    %3 = arith.mulf %2, %2 : vector<256x128xf32>
    %cst_3 = arith.constant 1.000000e-01 : f32
    %4 = vector.broadcast %cst_3 : f32 to vector<256x128xf32>
    %5 = arith.addf %3, %4 : vector<256x128xf32>
    %6 = arith.mulf %2, %5 : vector<256x128xf32>
    %cst_4 = arith.constant dense<0.000000e+00> : vector<256xf32>
    %7 = vector.multi_reduction <add>, %6, %cst_4 [1] : vector<256x128xf32> to vector<256xf32>
    %8 = vector.shape_cast %7 : vector<256xf32> to vector<256x1xf32>
    %c0_5 = arith.constant 0 : index
    %c0_6 = arith.constant 0 : index
    %9 = vector.load %arg3[%c0_5, %c0_6] : memref<256x1xf32, #tpu.memory_space<vmem>>, vector<256x1xf32>
    tpu.vector_store %arg3[%c0_5, %c0_6], %8 {strides = array<i32>} : memref<256x1xf32, #tpu.memory_space<vmem>>, vector<256x1xf32>,
    return
  }
  func.func @transform_0(%arg0: i32) -> (i32, i32) {
    %c0_i32 = arith.constant 0 : i32
    %c0_i32_0 = arith.constant 0 : i32
    return %arg0, %c0_i32 : i32, i32
  }
  func.func @transform_1(%arg0: i32) -> (i32, i32) {
    %c0_i32 = arith.constant 0 : i32
    %c0_i32_0 = arith.constant 0 : i32
    %c0_i32_1 = arith.constant 0 : i32
    return %c0_i32, %c0_i32_0 : i32, i32
  }
  func.func @transform_2(%arg0: i32) -> (i32, i32) {
    %c0_i32 = arith.constant 0 : i32
    %c0_i32_0 = arith.constant 0 : i32
    return %arg0, %c0_i32 : i32, i32
  }
}

</mosaic_0001>

<bundles_post_ra>
// kernel: tpu_custom_call.1
= control target key start
LH: loop header
LB: loop body
LE: loop exit
PB: predicated region body
PF: predicated region fallthrough
CT: control target
= control target key end

     0   :  { %7 = vsyncpa [#allocation3], 0  ;;  %s1011_s0 = inlined_call_operand.hbm [shape: bf16[256,128], index: 0, kind: input, shape index: {}]   ;;  %s1012_s1 = inlined_call_operand.hbm [shape: bf16[128,128], index: 1, kind: input, shape index: {}]   ;;  %s1013_s2 = inlined_call_operand.vmem [shape: f32[256,1], index: 2, kind: output, shape index: {}]  }
   0x1   :  { %8 = vsyncpa [#allocation5], 0  ;;  %s780_s9 = smov [#allocation2]   ;;  %s732_s13 = scalar_lea.hbm %s1011_s0, 2048 }
   0x2   :  { %s14_s10 = sshll.u32 %s780_s9, 4  ;;  %p733_p0 = scmp.ne.s32.totalorder %s1011_s0, %s732_s13  ;;  %s15_s10 = int_to_ptr.vmem [resolvable:$true] %s14_s10 }
   0x3   :  { %p736_p1 = scmp.lt.u32.totalorder %s732_s13, %s1011_s0 }
   0x5   :  { %p738_p2 = pnand %p736_p1, %p733_p0 }
   0x7   :  { %741 = shalt.err (!%p738_p2)
}
   0x8   :  { %s742_s18 = scalar_lea.vmem %s15_s10, 2048  ;;  %p747_p4 = scmp.lt.s32.totalorder %s15_s10, %s15_s10 }
   0x9   :  { %p743_p3 = scmp.ne.s32.totalorder %s15_s10, %s742_s18  ;;  %p748_p5 = scmp.lt.s32.totalorder %s742_s18, %s742_s18 }
   0xb   :  { %p749_p6 = por %p748_p5, %p747_p4 }
   0xd   :  { %p750_p7 = pnand %p749_p6, %p743_p3 }
   0xf   :  { %753 = shalt.err (!%p750_p7)
}
  0x10   :  { %s781_s19 = smov 64   ;;  %s782_s20 = smov 4  }
  0x11   :  { %20 = dma.hbm_to_vmem [thread:$0]  %s1011_s0, 2048, %s15_s10, [#allocation3], %s781_s19, %s781_s19, %s782_s20  }
  0x12   :  { %s783_s23 = smov [#allocation4]   ;;  %s754_s27 = scalar_lea.hbm %s1012_s1, 1024 }
  0x13   :  { %s26_s24 = sshll.u32 %s783_s23, 4  ;;  %p755_p8 = scmp.ne.s32.totalorder %s1012_s1, %s754_s27  ;;  %s27_s24 = int_to_ptr.vmem [resolvable:$true] %s26_s24 }
  0x14   :  { %p758_p9 = scmp.lt.u32.totalorder %s754_s27, %s1012_s1 }
  0x16   :  { %p760_p10 = pnand %p758_p9, %p755_p8 }
  0x18   :  { %763 = shalt.err (!%p760_p10)
}
  0x19   :  { %s764_s4 = scalar_lea.vmem %s27_s24, 1024  ;;  %p769_p12 = scmp.lt.s32.totalorder %s27_s24, %s27_s24 }
  0x1a   :  { %p765_p11 = scmp.ne.s32.totalorder %s27_s24, %s764_s4  ;;  %p770_p13 = scmp.lt.s32.totalorder %s764_s4, %s764_s4 }
  0x1c   :  { %p771_p0 = por %p770_p13, %p769_p12 }
  0x1e   :  { %p772_p1 = pnand %p771_p0, %p765_p11 }
  0x20   :  { %775 = shalt.err (!%p772_p1)
}
  0x21   :  { %32 = dma.hbm_to_vmem [thread:$0]  %s1012_s1, 1024, %s27_s24, [#allocation5], %s781_s19, %s781_s19, %s782_s20  }
  0x22   :  { %776 = dma.done.wait [#allocation3], 2048  }
  0x23   :  { %777 = vsyncadd [#allocation3], 4294965248 }
  0x24   :  { %778 = dma.done.wait [#allocation5], 1024  }
  0x25   :  { %779 = vsyncadd [#allocation5], 4294966272  ;;  %v708_v0 = vld [vmem:[#allocation4] sm:$0xff]   ;;  %v709_v1 = vld [vmem:[#allocation4 + $0x8] sm:$0xff]   ;;  %vm553_vm0 = vcmask 7168  }
  0x26   :  { %640 = vmatprep.subr.bf16.mxu0 %v708_v0  ;;  %688 = vmatprep.subr.bf16.mxu1 %v708_v0  ;;  %v710_v2 = vld [vmem:[#allocation4 + $0x10] sm:$0xff]   ;;  %v711_v3 = vld [vmem:[#allocation4 + $0x18] sm:$0xff]   ;;  %v716_v4 = vld [vmem:[#allocation2] sm:$0xff]  }
  0x27   :  { %641 = vmatpush3.bf16.msra.mxu0 %v708_v0  ;;  %696 = vmatpush3.bf16.msra.mxu1 %v708_v0  ;;  %v717_v5 = vld [vmem:[#allocation2 + $0x40] sm:$0xff]   ;;  %v713_v7 = vld [vmem:[#allocation4 + $0x28] sm:$0xff]   ;;  %v714_v8 = vld [vmem:[#allocation4 + $0x30] sm:$0xff]  }
  0x28   :  { %642 = vmatprep.subr.bf16.mxu0 %v709_v1  ;;  %689 = vmatprep.subr.bf16.mxu1 %v709_v1  ;;  %v712_v6 = vld [vmem:[#allocation4 + $0x20] sm:$0xff]   ;;  %v715_v9 = vld [vmem:[#allocation4 + $0x38] sm:$0xff]   ;;  %v718_v10 = vld [vmem:[#allocation2 + $0x8] sm:$0xff]  }
  0x29   :  { %656 = vmatprep.mubr.bf16.mxu0 %v716_v4  ;;  %672 = vmatprep.mubr.bf16.mxu1 %v717_v5  ;;  %v719_v11 = vld [vmem:[#allocation2 + $0x48] sm:$0xff]   ;;  %v720_v12 = vld [vmem:[#allocation2 + $0x10] sm:$0xff]   ;;  %v721_v14 = vld [vmem:[#allocation2 + $0x18] sm:$0xff]  }
  0x2a   :  { %v722_v13 = vld [vmem:[#allocation2 + $0x50] sm:$0xff]   ;;  %v723_v15 = vld [vmem:[#allocation2 + $0x58] sm:$0xff]   ;;  %v724_v16 = vld [vmem:[#allocation2 + $0x20] sm:$0xff]  }
  0x2b   :  { %643 = vmatpush3.bf16.msra.mxu0 %v709_v1  ;;  %697 = vmatpush3.bf16.msra.mxu1 %v709_v1  ;;  %v726_v17 = vld [vmem:[#allocation2 + $0x60] sm:$0xff]   ;;  %v725_v18 = vld [vmem:[#allocation2 + $0x28] sm:$0xff]   ;;  %v728_v20 = vld [vmem:[#allocation2 + $0x30] sm:$0xff]  }
  0x2c   :  { %644 = vmatprep.subr.bf16.mxu0 %v710_v2  ;;  %690 = vmatprep.subr.bf16.mxu1 %v710_v2  ;;  %v727_v19 = vld [vmem:[#allocation2 + $0x68] sm:$0xff]   ;;  %v730_v21 = vld [vmem:[#allocation2 + $0x70] sm:$0xff]   ;;  %v729_v22 = vld [vmem:[#allocation2 + $0x38] sm:$0xff]  }
  0x2d   :  { %v731_v23 = vld [vmem:[#allocation2 + $0x78] sm:$0xff]  }
  0x2f   :  { %645 = vmatpush3.bf16.msra.mxu0 %v710_v2  ;;  %698 = vmatpush3.bf16.msra.mxu1 %v710_v2 }
  0x30   :  { %646 = vmatprep.subr.bf16.mxu0 %v711_v3  ;;  %691 = vmatprep.subr.bf16.mxu1 %v711_v3 }
  0x33   :  { %647 = vmatpush3.bf16.msra.mxu0 %v711_v3  ;;  %699 = vmatpush3.bf16.msra.mxu1 %v711_v3 }
  0x34   :  { %648 = vmatprep.subr.bf16.mxu0 %v712_v6  ;;  %692 = vmatprep.subr.bf16.mxu1 %v712_v6 }
  0x37   :  { %649 = vmatpush3.bf16.msra.mxu0 %v712_v6  ;;  %700 = vmatpush3.bf16.msra.mxu1 %v712_v6 }
  0x38   :  { %650 = vmatprep.subr.bf16.mxu0 %v713_v7  ;;  %693 = vmatprep.subr.bf16.mxu1 %v713_v7 }
  0x3b   :  { %651 = vmatpush3.bf16.msra.mxu0 %v713_v7  ;;  %701 = vmatpush3.bf16.msra.mxu1 %v713_v7 }
  0x3c   :  { %652 = vmatprep.subr.bf16.mxu0 %v714_v8  ;;  %694 = vmatprep.subr.bf16.mxu1 %v714_v8 }
  0x3f   :  { %653 = vmatpush3.bf16.msra.mxu0 %v714_v8  ;;  %702 = vmatpush3.bf16.msra.mxu1 %v714_v8 }
  0x40   :  { %654 = vmatprep.subr.bf16.mxu0 %v715_v9  ;;  %695 = vmatprep.subr.bf16.mxu1 %v715_v9 }
  0x43   :  { %655 = vmatpush3.bf16.msra.mxu0 %v715_v9  ;;  %703 = vmatpush3.bf16.msra.mxu1 %v715_v9 }
  0x46   :  { %657 = vmatmul.mubr.bf16.vlgmr.msra.gmra.mrb[0].mxu0 %v718_v10  ;;  %673 = vmatmul.mubr.bf16.vlgmr.msra.gmra.mrb[0].mxu1 %v719_v11 }
  0x47   :  { %660 = vmatprep.mubr.bf16.mxu0 %v720_v12  ;;  %676 = vmatprep.mubr.bf16.mxu1 %v722_v13 }
  0x4e   :  { %661 = vmatmul.mubr.bf16.gmra.mrb[4].mxu0 %v721_v14  ;;  %677 = vmatmul.mubr.bf16.gmra.mrb[4].mxu1 %v723_v15 }
  0x4f   :  { %664 = vmatprep.mubr.bf16.mxu0 %v724_v16  ;;  %680 = vmatprep.mubr.bf16.mxu1 %v726_v17 }
  0x56   :  { %665 = vmatmul.mubr.bf16.gmra.mrb[8].mxu0 %v725_v18  ;;  %681 = vmatmul.mubr.bf16.gmra.mrb[8].mxu1 %v727_v19 }
  0x57   :  { %668 = vmatprep.mubr.bf16.mxu0 %v728_v20  ;;  %684 = vmatprep.mubr.bf16.mxu1 %v730_v21 }
  0x5e   :  { %669 = vmatmul.mubr.bf16.gmra.mrb[12].mxu0 %v729_v22  ;;  %685 = vmatmul.mubr.bf16.gmra.mrb[12].mxu1 %v731_v23 }
 0x119   :  { %v658_v24 = vpop.f32.mrb[0].mxu0  ;;  %v674_v25 = vpop.f32.mrb[0].mxu1 }
 0x11a   :  { %v395_v26 = vmul.f32 %v658_v24, %v658_v24  ;;  %v411_v27 = vmul.f32 %v674_v25, %v674_v25  ;;  %v266_v28 = vpop.f32.mrb[1].mxu0  ;;  %v330_v29 = vpop.f32.mrb[1].mxu1 }
 0x11b   :  { %v393_v30 = vmul.f32 %v266_v28, %v266_v28  ;;  %v659_v31 = vpop.f32.mrb[2].mxu0  ;;  %v675_v32 = vpop.f32.mrb[2].mxu1  ;;  %v409_v38 = vmul.f32 %v330_v29, %v330_v29 }
 0x11c   :  { %v396_v33 = vmul.f32 %v659_v31, %v659_v31  ;;  %v269_v34 = vpop.f32.mrb[3].mxu0  ;;  %v333_v35 = vpop.f32.mrb[3].mxu1  ;;  %v443_v36 = vadd.f32 0.1, %v411_v27  ;;  %v427_v37 = vadd.f32 0.1, %v395_v26  ;;  %v412_v39 = vmul.f32 %v675_v32, %v675_v32 }
 0x11d   :  { %v425_v40 = vadd.f32 0.1, %v393_v30  ;;  %v394_v44 = vmul.f32 %v269_v34, %v269_v34  ;;  %v410_v45 = vmul.f32 %v333_v35, %v333_v35  ;;  %v441_v48 = vadd.f32 0.1, %v409_v38 }
 0x11e   :  { %v428_v41 = vadd.f32 0.1, %v396_v33  ;;  %v475_v42 = vmul.f32 %v674_v25, %v443_v36  ;;  %v459_v43 = vmul.f32 %v658_v24, %v427_v37  ;;  %v444_v49 = vadd.f32 0.1, %v412_v39 }
 0x11f   :  { %v457_v51 = vmul.f32 %v425_v40, %v266_v28  ;;  %v426_v58 = vadd.f32 0.1, %v394_v44  ;;  %v442_v59 = vadd.f32 0.1, %v410_v45  ;;  %v473_v62 = vmul.f32 %v441_v48, %v330_v29 }
 0x120   :  { %525 = vadd.xlane.f32.xlu0 %v475_v42  ;;  %493 = vadd.xlane.f32.xlu1 %v459_v43  ;;  %v460_v52 = vmul.f32 %v659_v31, %v428_v41  ;;  %v476_v63 = vmul.f32 %v675_v32, %v444_v49 }
 0x121   :  { %v662_v46 = vpop.f32.mrb[4].mxu0  ;;  %v678_v47 = vpop.f32.mrb[4].mxu1  ;;  %v474_v1 = vmul.f32 %v442_v59, %v333_v35  ;;  %v458_v7 = vmul.f32 %v426_v58, %v269_v34 }
 0x122   :  { %v282_v50 = vpop.f32.mrb[5].mxu0  ;;  %v823_v53 = vpop.f32.mrb[5].mxu1  ;;  %v399_v60 = vmul.f32 %v662_v46, %v662_v46  ;;  %v415_v0 = vmul.f32 %v678_v47, %v678_v47 }
 0x123   :  { %v663_v54 = vpop.f32.mrb[6].mxu0  ;;  %v679_v55 = vpop.f32.mrb[6].mxu1  ;;  %v397_v14 = vmul.f32 %v282_v50, %v282_v50  ;;  %v413_v20 = vmul.f32 %v823_v53, %v823_v53 }
 0x124   :  { %489 = vadd.xlane.f32.xlu0 %v457_v51  ;;  %495 = vadd.xlane.f32.xlu1 %v460_v52  ;;  %v285_v56 = vpop.f32.mrb[7].mxu0  ;;  %v349_v57 = vpop.f32.mrb[7].mxu1  ;;  %v400_v61 = vmul.f32 %v663_v54, %v663_v54  ;;  %v431_v4 = vadd.f32 0.1, %v399_v60  ;;  %v416_v6 = vmul.f32 %v679_v55, %v679_v55  ;;  %v447_v15 = vadd.f32 0.1, %v415_v0 }
 0x125   :  { %v398_v16 = vmul.f32 %v285_v56, %v285_v56  ;;  %v414_v21 = vmul.f32 %v349_v57, %v349_v57  ;;  %v429_v24 = vadd.f32 0.1, %v397_v14  ;;  %v445_v34 = vadd.f32 0.1, %v413_v20 }
 0x126   :  { %v432_v5 = vadd.f32 0.1, %v400_v61  ;;  %v448_v17 = vadd.f32 0.1, %v416_v6  ;;  %v463_v18 = vmul.f32 %v662_v46, %v431_v4  ;;  %v479_v26 = vmul.f32 %v678_v47, %v447_v15 }
 0x127   :  { %v430_v25 = vadd.f32 0.1, %v398_v16  ;;  %v446_v35 = vadd.f32 0.1, %v414_v21  ;;  %v461_v38 = vmul.f32 %v429_v24, %v282_v50  ;;  %v477_v41 = vmul.f32 %v445_v34, %v823_v53 }
 0x128   :  { %521 = vadd.xlane.f32.xlu0 %v473_v62  ;;  %527 = vadd.xlane.f32.xlu1 %v476_v63  ;;  %v464_v19 = vmul.f32 %v663_v54, %v432_v5  ;;  %v480_v27 = vmul.f32 %v679_v55, %v448_v17 }
 0x129   :  { %v666_v2 = vpop.f32.mrb[8].mxu0  ;;  %v825_v3 = vpop.f32.mrb[8].mxu1  ;;  %v462_v39 = vmul.f32 %v430_v25, %v285_v56  ;;  %v478_v45 = vmul.f32 %v446_v35, %v349_v57 }
 0x12a   :  { %v827_v8 = vpop.f32.mrb[9].mxu0  ;;  %v829_v9 = vpop.f32.mrb[9].mxu1  ;;  %v403_v36 = vmul.f32 %v666_v2, %v666_v2  ;;  %v419_v40 = vmul.f32 %v825_v3, %v825_v3 }
 0x12b   :  { %v667_v10 = vpop.f32.mrb[10].mxu0  ;;  %v683_v11 = vpop.f32.mrb[10].mxu1  ;;  %v401_v46 = vmul.f32 %v827_v8, %v827_v8  ;;  %v417_v52 = vmul.f32 %v829_v9, %v829_v9 }
 0x12c   :  { %523 = vadd.xlane.f32.xlu1 %v474_v1  ;;  %491 = vadd.xlane.f32.xlu0 %v458_v7  ;;  %v831_v12 = vpop.f32.mrb[11].mxu0  ;;  %v833_v13 = vpop.f32.mrb[11].mxu1  ;;  %v404_v37 = vmul.f32 %v667_v10, %v667_v10  ;;  %v435_v42 = vadd.f32 0.1, %v403_v36  ;;  %v420_v44 = vmul.f32 %v683_v11, %v683_v11  ;;  %v451_v47 = vadd.f32 0.1, %v419_v40 }
 0x12d   :  { %v402_v48 = vmul.f32 %v831_v12, %v831_v12  ;;  %v418_v53 = vmul.f32 %v833_v13, %v833_v13  ;;  %v433_v54 = vadd.f32 0.1, %v401_v46  ;;  %v449_v58 = vadd.f32 0.1, %v417_v52 }
 0x12e   :  { %v436_v43 = vadd.f32 0.1, %v404_v37  ;;  %v452_v49 = vadd.f32 0.1, %v420_v44  ;;  %v467_v50 = vmul.f32 %v666_v2, %v435_v42  ;;  %v483_v56 = vmul.f32 %v825_v3, %v451_v47 }
 0x12f   :  { %v434_v55 = vadd.f32 0.1, %v402_v48  ;;  %v450_v59 = vadd.f32 0.1, %v418_v53  ;;  %v465_v62 = vmul.f32 %v433_v54, %v827_v8  ;;  %v481_v1 = vmul.f32 %v449_v58, %v829_v9 }
 0x130   :  { %501 = vadd.xlane.f32.xlu0 %v463_v18  ;;  %503 = vadd.xlane.f32.xlu1 %v464_v19  ;;  %v468_v51 = vmul.f32 %v667_v10, %v436_v43  ;;  %v484_v57 = vmul.f32 %v683_v11, %v452_v49 }
 0x131   :  { %v837_v22 = vpop.f32.mrb[12].mxu0  ;;  %v839_v23 = vpop.f32.mrb[12].mxu1  ;;  %v466_v63 = vmul.f32 %v434_v55, %v831_v12  ;;  %v482_v5 = vmul.f32 %v450_v59, %v833_v13 }
 0x132   :  { %v841_v28 = vpop.f32.mrb[13].mxu0  ;;  %v843_v29 = vpop.f32.mrb[13].mxu1  ;;  %v407_v60 = vmul.f32 %v837_v22, %v837_v22  ;;  %v423_v9 = vmul.f32 %v839_v23, %v839_v23 }
 0x133   :  { %v671_v30 = vpop.f32.mrb[14].mxu0  ;;  %v845_v31 = vpop.f32.mrb[14].mxu1  ;;  %v405_v0 = vmul.f32 %v841_v28, %v841_v28  ;;  %v421_v7 = vmul.f32 %v843_v29, %v843_v29 }
 0x134   :  { %533 = vadd.xlane.f32.xlu0 %v479_v26  ;;  %535 = vadd.xlane.f32.xlu1 %v480_v27  ;;  %v317_v32 = vpop.f32.mrb[15].mxu0  ;;  %v847_v33 = vpop.f32.mrb[15].mxu1  ;;  %v408_v61 = vmul.f32 %v671_v30, %v671_v30  ;;  %v439_v2 = vadd.f32 0.1, %v407_v60  ;;  %v424_v13 = vmul.f32 %v845_v31, %v845_v31  ;;  %v455_v18 = vadd.f32 0.1, %v423_v9 }
 0x135   :  { %v406_v4 = vmul.f32 %v317_v32, %v317_v32  ;;  %v437_v6 = vadd.f32 0.1, %v405_v0  ;;  %v422_v10 = vmul.f32 %v847_v33, %v847_v33  ;;  %v453_v15 = vadd.f32 0.1, %v421_v7 }
 0x136   :  { %v440_v3 = vadd.f32 0.1, %v408_v61  ;;  %v471_v11 = vmul.f32 %v837_v22, %v439_v2  ;;  %v456_v19 = vadd.f32 0.1, %v424_v13  ;;  %v487_v22 = vmul.f32 %v839_v23, %v455_v18 }
 0x137   :  { %v438_v8 = vadd.f32 0.1, %v406_v4  ;;  %v454_v16 = vadd.f32 0.1, %v422_v10  ;;  %v469_v17 = vmul.f32 %v437_v6, %v841_v28  ;;  %v485_v21 = vmul.f32 %v453_v15, %v843_v29 }
 0x138   :  { %497 = vadd.xlane.f32.xlu0 %v461_v38  ;;  %499 = vadd.xlane.f32.xlu1 %v462_v39  ;;  %v472_v12 = vmul.f32 %v671_v30, %v440_v3  ;;  %v488_v24 = vmul.f32 %v845_v31, %v456_v19 }
 0x139   :  { %v470_v14 = vmul.f32 %v438_v8, %v317_v32  ;;  %v486_v20 = vmul.f32 %v454_v16, %v847_v33 }
 0x13c   :  { %529 = vadd.xlane.f32.xlu0 %v477_v41  ;;  %531 = vadd.xlane.f32.xlu1 %v478_v45 }
 0x140   :  { %509 = vadd.xlane.f32.xlu0 %v467_v50  ;;  %511 = vadd.xlane.f32.xlu1 %v468_v51 }
 0x144   :  { %541 = vadd.xlane.f32.xlu0 %v483_v56  ;;  %543 = vadd.xlane.f32.xlu1 %v484_v57 }
 0x148   :  { %505 = vadd.xlane.f32.xlu0 %v465_v62  ;;  %507 = vadd.xlane.f32.xlu1 %v466_v63 }
 0x14c   :  { %537 = vadd.xlane.f32.xlu0 %v481_v1  ;;  %539 = vadd.xlane.f32.xlu1 %v482_v5 }
 0x150   :  { %517 = vadd.xlane.f32.xlu0 %v471_v11  ;;  %519 = vadd.xlane.f32.xlu1 %v472_v12 }
 0x154   :  { %513 = vadd.xlane.f32.xlu0 %v469_v17  ;;  %515 = vadd.xlane.f32.xlu1 %v470_v14 }
 0x158   :  { %545 = vadd.xlane.f32.xlu0 %v485_v21  ;;  %547 = vadd.xlane.f32.xlu1 %v486_v20 }
 0x15c   :  { %549 = vadd.xlane.f32.xlu0 %v487_v22  ;;  %551 = vadd.xlane.f32.xlu1 %v488_v24 }
 0x1ad   :  { %v526_v25 = vpop.xlane.xlu0 %525  ;;  %v494_v26 = vpop.xlane.xlu1 %493 }
 0x1ae   :  { %572 = vst.msk [vmem:[%s1013_s2 + $0x90] sm:$0xff] %vm553_vm0, %v526_v25  ;;  %556 = vst.msk [vmem:[%s1013_s2 + $0x10] sm:$0xff] %vm553_vm0, %v494_v26 }
 0x1b1   :  { %v490_v27 = vpop.xlane.xlu0 %489  ;;  %v496_v28 = vpop.xlane.xlu1 %495 }
 0x1b2   :  { %554 = vst.msk [vmem:[%s1013_s2] sm:$0xff] %vm553_vm0, %v490_v27  ;;  %557 = vst.msk [vmem:[%s1013_s2 + $0x18] sm:$0xff] %vm553_vm0, %v496_v28 }
 0x1b5   :  { %v522_v23 = vpop.xlane.xlu0 %521  ;;  %v528_v29 = vpop.xlane.xlu1 %527 }
 0x1b6   :  { %570 = vst.msk [vmem:[%s1013_s2 + $0x80] sm:$0xff] %vm553_vm0, %v522_v23  ;;  %573 = vst.msk [vmem:[%s1013_s2 + $0x98] sm:$0xff] %vm553_vm0, %v528_v29 }
 0x1b9   :  { %v524_v30 = vpop.xlane.xlu1 %523  ;;  %v492_v31 = vpop.xlane.xlu0 %491 }
 0x1ba   :  { %571 = vst.msk [vmem:[%s1013_s2 + $0x88] sm:$0xff] %vm553_vm0, %v524_v30  ;;  %555 = vst.msk [vmem:[%s1013_s2 + $0x8] sm:$0xff] %vm553_vm0, %v492_v31 }
 0x1bd   :  { %v502_v32 = vpop.xlane.xlu0 %501  ;;  %v504_v33 = vpop.xlane.xlu1 %503 }
 0x1be   :  { %560 = vst.msk [vmem:[%s1013_s2 + $0x30] sm:$0xff] %vm553_vm0, %v502_v32  ;;  %561 = vst.msk [vmem:[%s1013_s2 + $0x38] sm:$0xff] %vm553_vm0, %v504_v33 }
 0x1c1   :  { %v534_v34 = vpop.xlane.xlu0 %533  ;;  %v536_v35 = vpop.xlane.xlu1 %535 }
 0x1c2   :  { %576 = vst.msk [vmem:[%s1013_s2 + $0xb0] sm:$0xff] %vm553_vm0, %v534_v34  ;;  %577 = vst.msk [vmem:[%s1013_s2 + $0xb8] sm:$0xff] %vm553_vm0, %v536_v35 }
 0x1c5   :  { %v498_v36 = vpop.xlane.xlu0 %497  ;;  %v500_v37 = vpop.xlane.xlu1 %499 }
 0x1c6   :  { %558 = vst.msk [vmem:[%s1013_s2 + $0x20] sm:$0xff] %vm553_vm0, %v498_v36  ;;  %559 = vst.msk [vmem:[%s1013_s2 + $0x28] sm:$0xff] %vm553_vm0, %v500_v37 }
 0x1c9   :  { %v530_v38 = vpop.xlane.xlu0 %529  ;;  %v532_v39 = vpop.xlane.xlu1 %531 }
 0x1ca   :  { %574 = vst.msk [vmem:[%s1013_s2 + $0xa0] sm:$0xff] %vm553_vm0, %v530_v38  ;;  %575 = vst.msk [vmem:[%s1013_s2 + $0xa8] sm:$0xff] %vm553_vm0, %v532_v39 }
 0x1cd   :  { %v510_v40 = vpop.xlane.xlu0 %509  ;;  %v512_v41 = vpop.xlane.xlu1 %511 }
 0x1ce   :  { %564 = vst.msk [vmem:[%s1013_s2 + $0x50] sm:$0xff] %vm553_vm0, %v510_v40  ;;  %565 = vst.msk [vmem:[%s1013_s2 + $0x58] sm:$0xff] %vm553_vm0, %v512_v41 }
 0x1d1   :  { %v542_v42 = vpop.xlane.xlu0 %541  ;;  %v544_v43 = vpop.xlane.xlu1 %543 }
 0x1d2   :  { %580 = vst.msk [vmem:[%s1013_s2 + $0xd0] sm:$0xff] %vm553_vm0, %v542_v42  ;;  %581 = vst.msk [vmem:[%s1013_s2 + $0xd8] sm:$0xff] %vm553_vm0, %v544_v43 }
 0x1d5   :  { %v506_v44 = vpop.xlane.xlu0 %505  ;;  %v508_v45 = vpop.xlane.xlu1 %507 }
 0x1d6   :  { %562 = vst.msk [vmem:[%s1013_s2 + $0x40] sm:$0xff] %vm553_vm0, %v506_v44  ;;  %563 = vst.msk [vmem:[%s1013_s2 + $0x48] sm:$0xff] %vm553_vm0, %v508_v45 }
 0x1d9   :  { %v538_v46 = vpop.xlane.xlu0 %537  ;;  %v540_v47 = vpop.xlane.xlu1 %539 }
 0x1da   :  { %578 = vst.msk [vmem:[%s1013_s2 + $0xc0] sm:$0xff] %vm553_vm0, %v538_v46  ;;  %579 = vst.msk [vmem:[%s1013_s2 + $0xc8] sm:$0xff] %vm553_vm0, %v540_v47 }
 0x1dd   :  { %v518_v48 = vpop.xlane.xlu0 %517  ;;  %v520_v49 = vpop.xlane.xlu1 %519 }
 0x1de   :  { %568 = vst.msk [vmem:[%s1013_s2 + $0x70] sm:$0xff] %vm553_vm0, %v518_v48  ;;  %569 = vst.msk [vmem:[%s1013_s2 + $0x78] sm:$0xff] %vm553_vm0, %v520_v49 }
 0x1e1   :  { %v514_v50 = vpop.xlane.xlu0 %513  ;;  %v516_v51 = vpop.xlane.xlu1 %515 }
 0x1e2   :  { %566 = vst.msk [vmem:[%s1013_s2 + $0x60] sm:$0xff] %vm553_vm0, %v514_v50  ;;  %567 = vst.msk [vmem:[%s1013_s2 + $0x68] sm:$0xff] %vm553_vm0, %v516_v51 }
 0x1e5   :  { %v546_v52 = vpop.xlane.xlu0 %545  ;;  %v548_v53 = vpop.xlane.xlu1 %547 }
 0x1e6   :  { %582 = vst.msk [vmem:[%s1013_s2 + $0xe0] sm:$0xff] %vm553_vm0, %v546_v52  ;;  %583 = vst.msk [vmem:[%s1013_s2 + $0xe8] sm:$0xff] %vm553_vm0, %v548_v53 }
 0x1e9   :  { %v550_v54 = vpop.xlane.xlu0 %549  ;;  %v552_v55 = vpop.xlane.xlu1 %551 }
 0x1ea   :  { %584 = vst.msk [vmem:[%s1013_s2 + $0xf0] sm:$0xff] %vm553_vm0, %v550_v54  ;;  %585 = vst.msk [vmem:[%s1013_s2 + $0xf8] sm:$0xff] %vm553_vm0, %v552_v55 }
 0x1eb   :  { %590 = vsyncpa [#allocation3], 1 }
 0x1ec   :  { %591 = vsyncpa [#allocation5], 1 }

</bundles_post_ra>
